<compile_context>
chip_gen: v6e
topology: v6e:2x2x1
jax: 0.10.0
libtpu: 0.0.40
codegen_flags: <defaults>
</compile_context>

<pallas_src>
import functools

import jax
import jax.numpy as jnp
from jax import lax
from jax.experimental import pallas as pl
from jax.experimental.pallas import tpu as pltpu


# ----------------------------------------------------------------------------
# Fused stem kernel (one grid step == one image)
# ----------------------------------------------------------------------------
def _stem_kernel(mask_ref, x_ref, w1_ref, b1_ref, wdw_ref, bdw_ref, w3_ref,
                 b3_ref, o_ref, ypad_ref, *, Wo, G):
    # Per-image shapes (all 2-D, spatial flattened into lanes):
    #   mask_ref : (2, P)           row 0: (w != 0), row 1: (w != Wo-1) lane masks
    #   x_ref    : (16*Cin, P)      full 4x4-patch s2d input (K-major, lane-dense)
    #   w1_ref   : (Cexp, 16*Cin)   first_conv weights (BN scale folded)
    #   b1_ref   : (Cexp, 1)        first_conv BN shift
    #   wdw_ref  : (Cexp, 9)        depthwise weights, k = kh*3+kw (BN scale folded)
    #   bdw_ref  : (Cexp, 1)        depthwise BN shift
    #   w3_ref   : (Cout, Cexp)     reduce_1x1 weights (BN scale folded)
    #   b3_ref   : (Cout, 1)        reduce_1x1 BN shift
    #   o_ref    : (Cout, P)        channels-major output slab (NCHW w/o transpose)
    #   ypad_ref : (Cexp, G+P+G)    flat dw scratch with zero guard bands
    P = o_ref.shape[-1]
    Cexp = ypad_ref.shape[0]

    # ---- first_conv: one merged K=16*Cin matmul on the MXU -> (Cexp, P) ----
    y = jnp.dot(w1_ref[...], x_ref[...], preferred_element_type=jnp.float32)
    y = jnp.clip(y + b1_ref[...], 0.0, 6.0)

    # ---- border-only scratch init + lane-aligned interior store ----
    ypad_ref[:, 0:G] = jnp.zeros((Cexp, G), jnp.float32)
    ypad_ref[:, G + P:G + P + G] = jnp.zeros((Cexp, G), jnp.float32)
    ypad_ref[:, G:G + P] = y

    # ---- depthwise conv_3x3 (stride 1, SAME) + ReLU6 on the VPU ----
    # Tap (kh, kw) of the flat scratch is a plain lane-offset slice; the only
    # incorrect lanes are the row-wrap positions, which the kw-group masks kill.
    wdw = wdw_ref[...]                                        # (Cexp, 9)
    groups = []
    for kw in range(3):
        acc = None
        for kh in range(3):
            k = kh * 3 + kw
            s = G + (kh - 1) * Wo + (kw - 1)
            tap = ypad_ref[:, s:s + P] * wdw[:, k:k + 1]      # (Cexp,P)*(Cexp,1)
            acc = tap if acc is None else acc + tap
        groups.append(acc)
    m0 = mask_ref[0:1, :]                                     # (1, P) sublane-bcast
    m2 = mask_ref[1:2, :]
    ydw = groups[0] * m0 + groups[1] + groups[2] * m2
    ydw = jnp.clip(ydw + bdw_ref[...], 0.0, 6.0)              # (Cexp, P)

    # ---- reduce_1x1 (BN, no activation), channels-major output ----
    z = jnp.dot(w3_ref[...], ydw, preferred_element_type=jnp.float32)
    o_ref[...] = (z + b3_ref[...]).astype(o_ref.dtype)


# ----------------------------------------------------------------------------
# Plain-JAX layout glue (TF SAME padding, 4x4-patch space-to-depth) + wrapper
# ----------------------------------------------------------------------------
def tf_same_pad_nhwc(x, stride, kernel_size, dilation=1):
    """TensorFlow-style SAME padding (matches apply_tf_padding), NHWC layout."""
    H, W = int(x.shape[1]), int(x.shape[2])

    def pad_along(size):
        if size % stride == 0:
            return max(kernel_size - stride, 0)
        return max(kernel_size - size % stride, 0)

    ph, pw = pad_along(H), pad_along(W)
    pt, pb = ph // 2, ph - ph // 2
    pleft, pright = pw // 2, pw - pw // 2
    return jnp.pad(
        x,
        ((0, 0),
         (pt * dilation, pb * dilation),
         (pleft * dilation, pright * dilation),
         (0, 0)),
    )


def mobilenetv2_stem_forward(x_nchw, p):
    """Forward pass of MobileNetV2Stem. Input/output in NCHW like PyTorch."""
    x = jnp.transpose(x_nchw, (0, 2, 3, 1)).astype(jnp.float32)   # -> NHWC
    B, H, W, Cin = x.shape
    Ho, Wo = -(-H // 2), -(-W // 2)                               # ceil(H/2), ceil(W/2)
    P = Ho * Wo
    Cexp = p["w1m"].shape[0]
    Cout = p["w3"].shape[0]
    G = ((Wo + 1 + 127) // 128) * 128                             # guard band (>= Wo+1)
    L = 2 * G + P

    # TF-SAME pad for the 3x3/s2 conv, extend to an even (2*(Ho+1), 2*(Wo+1)) canvas
    # (extra rows/cols only hit the zero-padded weight taps).
    xp = tf_same_pad_nhwc(x, stride=2, kernel_size=3)
    Hs, Ws = 2 * (Ho + 1), 2 * (Wo + 1)
    xp = jnp.pad(xp, ((0, 0), (0, Hs - xp.shape[1]), (0, Ws - xp.shape[2]), (0, 0)))

    # Full 4x4-patch space-to-depth: (B, 16*Cin, P), K ordered (pr, pc, c),
    # pr = 2*di + r2, pc = 2*dj + c2. Lane-dense, one K=16*Cin matmul in-kernel.
    xs = xp.reshape(B, Ho + 1, 2, Wo + 1, 2, Cin)
    taps = [xs[:, di:di + Ho, :, dj:dj + Wo, :, :] for di in (0, 1) for dj in (0, 1)]
    stk = jnp.stack(taps, axis=1).reshape(B, 2, 2, Ho, 2, Wo, 2, Cin)
    #           axes: (B, di, dj, i, r2, j, c2, c) -> (B, di, r2, dj, c2, c, i, j)
    xpatch = stk.transpose(0, 1, 4, 2, 6, 7, 3, 5).reshape(B, 16 * Cin, P)

    # Lane masks killing the row-wrap lanes of the left/right depthwise taps.
    wi = jnp.arange(P, dtype=jnp.int32) % Wo
    masks = jnp.stack([(wi != 0), (wi != Wo - 1)]).astype(jnp.float32)  # (2, P)

    kernel = functools.partial(_stem_kernel, Wo=Wo, G=G)
    out = pl.pallas_call(
        kernel,
        out_shape=jax.ShapeDtypeStruct((B, Cout, P), jnp.float32),
        grid=(B,),
        in_specs=[
            pl.BlockSpec((2, P), lambda b: (0, 0)),
            pl.BlockSpec((None, 16 * Cin, P), lambda b: (b, 0, 0)),
            pl.BlockSpec((Cexp, 16 * Cin), lambda b: (0, 0)),
            pl.BlockSpec((Cexp, 1), lambda b: (0, 0)),
            pl.BlockSpec((Cexp, 9), lambda b: (0, 0)),
            pl.BlockSpec((Cexp, 1), lambda b: (0, 0)),
            pl.BlockSpec((Cout, Cexp), lambda b: (0, 0)),
            pl.BlockSpec((Cout, 1), lambda b: (0, 0)),
        ],
        out_specs=pl.BlockSpec((None, Cout, P), lambda b: (b, 0, 0)),
        scratch_shapes=[pltpu.VMEM((Cexp, L), jnp.float32)],
        compiler_params=pltpu.CompilerParams(
            dimension_semantics=("parallel",),
            vmem_limit_bytes=32 * 1024 * 1024,
        ),
    )(masks, xpatch, p["w1m"], p["b1"], p["wdw"], p["bdw"], p["w3"], p["b3"])

    # (B, Cout, P) is already NCHW modulo a free reshape (same HBM bytes).
    return out.reshape(B, Cout, Ho, Wo)


# ----------------------------------------------------------------------------
# Pure-JAX reference (lax.conv) for correctness check
# ----------------------------------------------------------------------------
def fold_batchnorm(gamma, beta, mean, var, eps):
    scale = gamma / jnp.sqrt(var + eps)
    shift = beta - mean * scale
    return scale, shift


def reference_stem(x_nchw, raw):
    eps = raw["eps"]
    x = jnp.transpose(x_nchw, (0, 2, 3, 1))
    dn = ("NHWC", "HWIO", "NHWC")

    # first_conv
    xp = tf_same_pad_nhwc(x, 2, 3)
    w1 = jnp.transpose(raw["w1_torch"], (2, 3, 1, 0))             # HWIO
    y = lax.conv_general_dilated(xp, w1, (2, 2), "VALID", dimension_numbers=dn)
    s, b = fold_batchnorm(raw["g1"], raw["b1"], raw["m1"], raw["v1"], eps)
    y = jnp.clip(y * s + b, 0.0, 6.0)

    # depthwise conv_3x3
    yp = tf_same_pad_nhwc(y, 1, 3)
    wdw = jnp.transpose(raw["wdw_torch"], (2, 3, 1, 0))           # (3,3,1,C)
    C = wdw.shape[-1]
    y = lax.conv_general_dilated(yp, wdw, (1, 1), "VALID",
                                 dimension_numbers=dn, feature_group_count=C)
    s, b = fold_batchnorm(raw["g2"], raw["b2"], raw["m2"], raw["v2"], eps)
    y = jnp.clip(y * s + b, 0.0, 6.0)

    # reduce_1x1
    w3 = jnp.transpose(raw["w3_torch"], (2, 3, 1, 0))             # (1,1,Cin,Cout)
    y = lax.conv_general_dilated(y, w3, (1, 1), "VALID", dimension_numbers=dn)
    s, b = fold_batchnorm(raw["g3"], raw["b3"], raw["m3"], raw["v3"], eps)
    y = y * s + b
    return jnp.transpose(y, (0, 3, 1, 2))


# ----------------------------------------------------------------------------
# Deterministic parameter construction + main
# ----------------------------------------------------------------------------
def make_params(key, c_in, c_exp, c_out, eps):
    ks = jax.random.split(key, 6)

    def bn(k, c):
        k0, k1, k2, k3 = jax.random.split(k, 4)
        gamma = 1.0 + 0.1 * jax.random.normal(k0, (c,), jnp.float32)
        beta = 0.05 * jax.random.normal(k1, (c,), jnp.float32)
        mean = 0.1 * jax.random.normal(k2, (c,), jnp.float32)
        var = 0.5 + 0.5 * jnp.abs(jax.random.normal(k3, (c,), jnp.float32))
        return gamma, beta, mean, var

    # torch-layout conv weights
    w1_torch = 0.2 * jax.random.normal(ks[0], (c_exp, c_in, 3, 3), jnp.float32)
    wdw_torch = 0.2 * jax.random.normal(ks[1], (c_exp, 1, 3, 3), jnp.float32)
    w3_torch = 0.2 * jax.random.normal(ks[2], (c_out, c_exp, 1, 1), jnp.float32)

    g1, b1, m1, v1 = bn(ks[3], c_exp)
    g2, b2, m2, v2 = bn(ks[4], c_exp)
    g3, b3, m3, v3 = bn(ks[5], c_out)

    raw = dict(w1_torch=w1_torch, wdw_torch=wdw_torch, w3_torch=w3_torch,
               g1=g1, b1=b1, m1=m1, v1=v1,
               g2=g2, b2=b2, m2=m2, v2=v2,
               g3=g3, b3=b3, m3=m3, v3=v3, eps=eps)

    s1, sh1 = fold_batchnorm(g1, b1, m1, v1, eps)
    s2, sh2 = fold_batchnorm(g2, b2, m2, v2, eps)
    s3, sh3 = fold_batchnorm(g3, b3, m3, v3, eps)

    # first_conv -> merged 4x4-patch weights (Cexp, 16*Cin), K ordered (pr, pc, c),
    # zero-padded rows/cols 3, BN scale folded per output channel (exact, pre-act).
    w1_hwio = jnp.transpose(w1_torch, (2, 3, 1, 0))               # (3,3,Cin,Cexp)
    w1_pad = jnp.pad(w1_hwio, ((0, 1), (0, 1), (0, 0), (0, 0)))   # (4,4,Cin,Cexp)
    w1m = (w1_pad.reshape(16 * c_in, c_exp) * s1[None, :]).T      # (Cexp, 16*Cin)

    # depthwise (Cexp,1,3,3) -> (Cexp, 9), k = kh*3+kw, BN scale folded per channel
    wdw = wdw_torch[:, 0].reshape(c_exp, 9) * s2[:, None]

    # reduce_1x1 (Cout,Cexp,1,1) -> (Cout, Cexp), BN scale folded per row
    w3 = w3_torch[:, :, 0, 0] * s3[:, None]

    kernel_params = dict(
        w1m=w1m, b1=sh1.reshape(c_exp, 1),
        wdw=wdw, bdw=sh2.reshape(c_exp, 1),
        w3=w3, b3=sh3.reshape(c_out, 1),
    )
    return kernel_params, raw


if __name__ == "__main__":
    B, C_IN, H, W = 2, 3, 16, 16
    C_EXP, C_OUT = 32, 16
    EPS = 1e-3

    key = jax.random.PRNGKey(0)
    k_x, k_p = jax.random.split(key)
    x = jax.random.normal(k_x, (B, C_IN, H, W), jnp.float32)

    params, raw = make_params(k_p, C_IN, C_EXP, C_OUT, EPS)

    fwd = jax.jit(mobilenetv2_stem_forward)
    out = jax.block_until_ready(fwd(x, params))

    ref = jax.block_until_ready(reference_stem(x, raw))
    assert out.shape == (B, C_OUT, H // 2, W // 2), out.shape
    max_err = float(jnp.max(jnp.abs(out - ref)))
    assert jnp.allclose(out, ref, rtol=2e-3, atol=2e-3), max_err

    print("KERNEL_OK")
</pallas_src>

<mosaic_0001>
module attributes {stable_mosaic.version = 11 : i64} {
  func.func @_stem_kernel(%arg0: i32, %arg1: memref<2x64xf32, #tpu.memory_space<vmem>>, %arg2: memref<1x48x64xf32, #tpu.memory_space<vmem>>, %arg3: memref<32x48xf32, #tpu.memory_space<vmem>>, %arg4: memref<32x1xf32, #tpu.memory_space<vmem>>, %arg5: memref<32x9xf32, #tpu.memory_space<vmem>>, %arg6: memref<32x1xf32, #tpu.memory_space<vmem>>, %arg7: memref<16x32xf32, #tpu.memory_space<vmem>>, %arg8: memref<16x1xf32, #tpu.memory_space<vmem>>, %arg9: memref<1x16x64xf32, #tpu.memory_space<vmem>>, %arg10: memref<32x320xf32, #tpu.memory_space<vmem>>) attributes {dimension_semantics = [#tpu.dimension_semantics<parallel>], iteration_bounds = array<i64: 2>, scalar_prefetch = 0 : i64, scratch_operands = 1 : i64, tpu.core_type = #tpu.core_type<tc>, window_params = [{pipeline_mode = #tpu.pipeline_mode<synchronous>, transform_indices = @transform_0, window_bounds = array<i64: 2, 64>}, {transform_indices = @transform_1, window_bounds = array<i64: 1, 48, 64>}, {pipeline_mode = #tpu.pipeline_mode<synchronous>, transform_indices = @transform_2, window_bounds = array<i64: 32, 48>}, {pipeline_mode = #tpu.pipeline_mode<synchronous>, transform_indices = @transform_3, window_bounds = array<i64: 32, 1>}, {pipeline_mode = #tpu.pipeline_mode<synchronous>, transform_indices = @transform_4, window_bounds = array<i64: 32, 9>}, {pipeline_mode = #tpu.pipeline_mode<synchronous>, transform_indices = @transform_5, window_bounds = array<i64: 32, 1>}, {pipeline_mode = #tpu.pipeline_mode<synchronous>, transform_indices = @transform_6, window_bounds = array<i64: 16, 32>}, {pipeline_mode = #tpu.pipeline_mode<synchronous>, transform_indices = @transform_7, window_bounds = array<i64: 16, 1>}, {transform_indices = @transform_8, window_bounds = array<i64: 1, 16, 64>}]} {
    %c0 = arith.constant 0 : index
    %c0_0 = arith.constant 0 : index
    %0 = vector.load %arg3[%c0, %c0_0] : memref<32x48xf32, #tpu.memory_space<vmem>>, vector<32x48xf32>
    %c0_1 = arith.constant 0 : index
    %c0_2 = arith.constant 0 : index
    %c0_3 = arith.constant 0 : index
    %1 = vector.load %arg2[%c0_1, %c0_2, %c0_3] : memref<1x48x64xf32, #tpu.memory_space<vmem>>, vector<1x48x64xf32>
    %2 = vector.shape_cast %1 : vector<1x48x64xf32> to vector<48x64xf32>
    %cst = arith.constant dense<0.000000e+00> : vector<32x64xf32>
    %3 = tpu.matmul %0, %2, %cst {dimension_numbers = #tpu.dot_dimension_numbers<[1], [0], [0], [1], [0, 0, 1, 1], [], []>} : vector<32x48xf32>, vector<48x64xf32>, vector<32x64xf32> -> vector<32x64xf32>
    %c0_4 = arith.constant 0 : index
    %c0_5 = arith.constant 0 : index
    %4 = vector.load %arg4[%c0_4, %c0_5] : memref<32x1xf32, #tpu.memory_space<vmem>>, vector<32x1xf32>
    %5 = vector.broadcast %4 : vector<32x1xf32> to vector<32x64xf32>
    %6 = arith.addf %3, %5 : vector<32x64xf32>
    %cst_6 = arith.constant 0.000000e+00 : f32
    %cst_7 = arith.constant 6.000000e+00 : f32
    %7 = vector.broadcast %cst_6 : f32 to vector<32x64xf32>
    %8 = arith.maximumf %7, %6 : vector<32x64xf32>
    %9 = vector.broadcast %cst_7 : f32 to vector<32x64xf32>
    %10 = arith.minimumf %9, %8 : vector<32x64xf32>
    %cst_8 = arith.constant 0.000000e+00 : f32
    %11 = vector.broadcast %cst_8 : f32 to vector<32x128xf32>
    %c0_9 = arith.constant 0 : index
    %c0_10 = arith.constant 0 : index
    %12 = vector.load %arg10[%c0_9, %c0_10] : memref<32x320xf32, #tpu.memory_space<vmem>>, vector<32x128xf32>
    tpu.vector_store %arg10[%c0_9, %c0_10], %11 {strides = array<i32>} : memref<32x320xf32, #tpu.memory_space<vmem>>, vector<32x128xf32>,
    %cst_11 = arith.constant 0.000000e+00 : f32
    %13 = vector.broadcast %cst_11 : f32 to vector<32x128xf32>
    %c0_12 = arith.constant 0 : index
    %c192 = arith.constant 192 : index
    %14 = vector.load %arg10[%c0_12, %c192] : memref<32x320xf32, #tpu.memory_space<vmem>>, vector<32x128xf32>
    tpu.vector_store %arg10[%c0_12, %c192], %13 {strides = array<i32>} : memref<32x320xf32, #tpu.memory_space<vmem>>, vector<32x128xf32>,
    %c0_13 = arith.constant 0 : index
    %c128 = arith.constant 128 : index
    %15 = vector.load %arg10[%c0_13, %c128] : memref<32x320xf32, #tpu.memory_space<vmem>>, vector<32x64xf32>
    tpu.vector_store %arg10[%c0_13, %c128], %10 {strides = array<i32>} : memref<32x320xf32, #tpu.memory_space<vmem>>, vector<32x64xf32>,
    %c0_14 = arith.constant 0 : index
    %c0_15 = arith.constant 0 : index
    %16 = vector.load %arg5[%c0_14, %c0_15] : memref<32x9xf32, #tpu.memory_space<vmem>>, vector<32x9xf32>
    %c0_16 = arith.constant 0 : index
    %c119 = arith.constant 119 : index
    %17 = vector.load %arg10[%c0_16, %c119] : memref<32x320xf32, #tpu.memory_space<vmem>>, vector<32x64xf32>
    %18 = vector.extract_strided_slice %16 {offsets = [0, 0], sizes = [32, 1], strides = [1, 1]} : vector<32x9xf32> to vector<32x1xf32>
    %19 = vector.broadcast %18 : vector<32x1xf32> to vector<32x64xf32>
    %20 = arith.mulf %17, %19 : vector<32x64xf32>
    %c0_17 = arith.constant 0 : index
    %c127 = arith.constant 127 : index
    %21 = vector.load %arg10[%c0_17, %c127] : memref<32x320xf32, #tpu.memory_space<vmem>>, vector<32x64xf32>
    %22 = vector.extract_strided_slice %16 {offsets = [0, 3], sizes = [32, 1], strides = [1, 1]} : vector<32x9xf32> to vector<32x1xf32>
    %23 = vector.broadcast %22 : vector<32x1xf32> to vector<32x64xf32>
    %24 = arith.mulf %21, %23 : vector<32x64xf32>
    %25 = arith.addf %20, %24 : vector<32x64xf32>
    %c0_18 = arith.constant 0 : index
    %c135 = arith.constant 135 : index
    %26 = vector.load %arg10[%c0_18, %c135] : memref<32x320xf32, #tpu.memory_space<vmem>>, vector<32x64xf32>
    %27 = vector.extract_strided_slice %16 {offsets = [0, 6], sizes = [32, 1], strides = [1, 1]} : vector<32x9xf32> to vector<32x1xf32>
    %28 = vector.broadcast %27 : vector<32x1xf32> to vector<32x64xf32>
    %29 = arith.mulf %26, %28 : vector<32x64xf32>
    %30 = arith.addf %25, %29 : vector<32x64xf32>
    %c0_19 = arith.constant 0 : index
    %c120 = arith.constant 120 : index
    %31 = vector.load %arg10[%c0_19, %c120] : memref<32x320xf32, #tpu.memory_space<vmem>>, vector<32x64xf32>
    %32 = vector.extract_strided_slice %16 {offsets = [0, 1], sizes = [32, 1], strides = [1, 1]} : vector<32x9xf32> to vector<32x1xf32>
    %33 = vector.broadcast %32 : vector<32x1xf32> to vector<32x64xf32>
    %34 = arith.mulf %31, %33 : vector<32x64xf32>
    %c0_20 = arith.constant 0 : index
    %c128_21 = arith.constant 128 : index
    %35 = vector.load %arg10[%c0_20, %c128_21] : memref<32x320xf32, #tpu.memory_space<vmem>>, vector<32x64xf32>
    %36 = vector.extract_strided_slice %16 {offsets = [0, 4], sizes = [32, 1], strides = [1, 1]} : vector<32x9xf32> to vector<32x1xf32>
    %37 = vector.broadcast %36 : vector<32x1xf32> to vector<32x64xf32>
    %38 = arith.mulf %35, %37 : vector<32x64xf32>
    %39 = arith.addf %34, %38 : vector<32x64xf32>
    %c0_22 = arith.constant 0 : index
    %c136 = arith.constant 136 : index
    %40 = vector.load %arg10[%c0_22, %c136] : memref<32x320xf32, #tpu.memory_space<vmem>>, vector<32x64xf32>
    %41 = vector.extract_strided_slice %16 {offsets = [0, 7], sizes = [32, 1], strides = [1, 1]} : vector<32x9xf32> to vector<32x1xf32>
    %42 = vector.broadcast %41 : vector<32x1xf32> to vector<32x64xf32>
    %43 = arith.mulf %40, %42 : vector<32x64xf32>
    %44 = arith.addf %39, %43 : vector<32x64xf32>
    %c0_23 = arith.constant 0 : index
    %c121 = arith.constant 121 : index
    %45 = vector.load %arg10[%c0_23, %c121] : memref<32x320xf32, #tpu.memory_space<vmem>>, vector<32x64xf32>
    %46 = vector.extract_strided_slice %16 {offsets = [0, 2], sizes = [32, 1], strides = [1, 1]} : vector<32x9xf32> to vector<32x1xf32>
    %47 = vector.broadcast %46 : vector<32x1xf32> to vector<32x64xf32>
    %48 = arith.mulf %45, %47 : vector<32x64xf32>
    %c0_24 = arith.constant 0 : index
    %c129 = arith.constant 129 : index
    %49 = vector.load %arg10[%c0_24, %c129] : memref<32x320xf32, #tpu.memory_space<vmem>>, vector<32x64xf32>
    %50 = vector.extract_strided_slice %16 {offsets = [0, 5], sizes = [32, 1], strides = [1, 1]} : vector<32x9xf32> to vector<32x1xf32>
    %51 = vector.broadcast %50 : vector<32x1xf32> to vector<32x64xf32>
    %52 = arith.mulf %49, %51 : vector<32x64xf32>
    %53 = arith.addf %48, %52 : vector<32x64xf32>
    %c0_25 = arith.constant 0 : index
    %c137 = arith.constant 137 : index
    %54 = vector.load %arg10[%c0_25, %c137] : memref<32x320xf32, #tpu.memory_space<vmem>>, vector<32x64xf32>
    %55 = vector.extract_strided_slice %16 {offsets = [0, 8], sizes = [32, 1], strides = [1, 1]} : vector<32x9xf32> to vector<32x1xf32>
    %56 = vector.broadcast %55 : vector<32x1xf32> to vector<32x64xf32>
    %57 = arith.mulf %54, %56 : vector<32x64xf32>
    %58 = arith.addf %53, %57 : vector<32x64xf32>
    %c0_26 = arith.constant 0 : index
    %c0_27 = arith.constant 0 : index
    %59 = vector.load %arg1[%c0_26, %c0_27] : memref<2x64xf32, #tpu.memory_space<vmem>>, vector<1x64xf32>
    %c1 = arith.constant 1 : index
    %c0_28 = arith.constant 0 : index
    %60 = vector.load %arg1[%c1, %c0_28] : memref<2x64xf32, #tpu.memory_space<vmem>>, vector<1x64xf32>
    %61 = vector.broadcast %59 : vector<1x64xf32> to vector<32x64xf32>
    %62 = arith.mulf %30, %61 : vector<32x64xf32>
    %63 = arith.addf %62, %44 : vector<32x64xf32>
    %64 = vector.broadcast %60 : vector<1x64xf32> to vector<32x64xf32>
    %65 = arith.mulf %58, %64 : vector<32x64xf32>
    %66 = arith.addf %63, %65 : vector<32x64xf32>
    %c0_29 = arith.constant 0 : index
    %c0_30 = arith.constant 0 : index
    %67 = vector.load %arg6[%c0_29, %c0_30] : memref<32x1xf32, #tpu.memory_space<vmem>>, vector<32x1xf32>
    %68 = vector.broadcast %67 : vector<32x1xf32> to vector<32x64xf32>
    %69 = arith.addf %66, %68 : vector<32x64xf32>
    %cst_31 = arith.constant 0.000000e+00 : f32
    %cst_32 = arith.constant 6.000000e+00 : f32
    %70 = vector.broadcast %cst_31 : f32 to vector<32x64xf32>
    %71 = arith.maximumf %70, %69 : vector<32x64xf32>
    %72 = vector.broadcast %cst_32 : f32 to vector<32x64xf32>
    %73 = arith.minimumf %72, %71 : vector<32x64xf32>
    %c0_33 = arith.constant 0 : index
    %c0_34 = arith.constant 0 : index
    %74 = vector.load %arg7[%c0_33, %c0_34] : memref<16x32xf32, #tpu.memory_space<vmem>>, vector<16x32xf32>
    %cst_35 = arith.constant dense<0.000000e+00> : vector<16x64xf32>
    %75 = tpu.matmul %74, %73, %cst_35 {dimension_numbers = #tpu.dot_dimension_numbers<[1], [0], [0], [1], [0, 0, 1, 1], [], []>} : vector<16x32xf32>, vector<32x64xf32>, vector<16x64xf32> -> vector<16x64xf32>
    %c0_36 = arith.constant 0 : index
    %c0_37 = arith.constant 0 : index
    %76 = vector.load %arg8[%c0_36, %c0_37] : memref<16x1xf32, #tpu.memory_space<vmem>>, vector<16x1xf32>
    %77 = vector.broadcast %76 : vector<16x1xf32> to vector<16x64xf32>
    %78 = arith.addf %75, %77 : vector<16x64xf32>
    %c0_38 = arith.constant 0 : index
    %c0_39 = arith.constant 0 : index
    %c0_40 = arith.constant 0 : index
    %79 = vector.load %arg9[%c0_38, %c0_39, %c0_40] : memref<1x16x64xf32, #tpu.memory_space<vmem>>, vector<1x16x64xf32>
    %80 = vector.shape_cast %79 : vector<1x16x64xf32> to vector<16x64xf32>
    %81 = vector.shape_cast %78 : vector<16x64xf32> to vector<1x16x64xf32>
    tpu.vector_store %arg9[%c0_38, %c0_39, %c0_40], %81 {strides = array<i32>} : memref<1x16x64xf32, #tpu.memory_space<vmem>>, vector<1x16x64xf32>,
    return
  }
  func.func @transform_0(%arg0: i32) -> (i32, i32) {
    %c0_i32 = arith.constant 0 : i32
    %c0_i32_0 = arith.constant 0 : i32
    %c0_i32_1 = arith.constant 0 : i32
    return %c0_i32, %c0_i32_0 : i32, i32
  }
  func.func @transform_1(%arg0: i32) -> (i32, i32, i32) {
    %c0_i32 = arith.constant 0 : i32
    %c0_i32_0 = arith.constant 0 : i32
    %c0_i32_1 = arith.constant 0 : i32
    return %arg0, %c0_i32, %c0_i32_0 : i32, i32, i32
  }
  func.func @transform_2(%arg0: i32) -> (i32, i32) {
    %c0_i32 = arith.constant 0 : i32
    %c0_i32_0 = arith.constant 0 : i32
    %c0_i32_1 = arith.constant 0 : i32
    return %c0_i32, %c0_i32_0 : i32, i32
  }
  func.func @transform_3(%arg0: i32) -> (i32, i32) {
    %c0_i32 = arith.constant 0 : i32
    %c0_i32_0 = arith.constant 0 : i32
    %c0_i32_1 = arith.constant 0 : i32
    return %c0_i32, %c0_i32_0 : i32, i32
  }
  func.func @transform_4(%arg0: i32) -> (i32, i32) {
    %c0_i32 = arith.constant 0 : i32
    %c0_i32_0 = arith.constant 0 : i32
    %c0_i32_1 = arith.constant 0 : i32
    return %c0_i32, %c0_i32_0 : i32, i32
  }
  func.func @transform_5(%arg0: i32) -> (i32, i32) {
    %c0_i32 = arith.constant 0 : i32
    %c0_i32_0 = arith.constant 0 : i32
    %c0_i32_1 = arith.constant 0 : i32
    return %c0_i32, %c0_i32_0 : i32, i32
  }
  func.func @transform_6(%arg0: i32) -> (i32, i32) {
    %c0_i32 = arith.constant 0 : i32
    %c0_i32_0 = arith.constant 0 : i32
    %c0_i32_1 = arith.constant 0 : i32
    return %c0_i32, %c0_i32_0 : i32, i32
  }
  func.func @transform_7(%arg0: i32) -> (i32, i32) {
    %c0_i32 = arith.constant 0 : i32
    %c0_i32_0 = arith.constant 0 : i32
    %c0_i32_1 = arith.constant 0 : i32
    return %c0_i32, %c0_i32_0 : i32, i32
  }
  func.func @transform_8(%arg0: i32) -> (i32, i32, i32) {
    %c0_i32 = arith.constant 0 : i32
    %c0_i32_0 = arith.constant 0 : i32
    %c0_i32_1 = arith.constant 0 : i32
    return %arg0, %c0_i32, %c0_i32_0 : i32, i32, i32
  }
}

</mosaic_0001>

<bundles_post_ra>
// kernel: mobilenetv2_stem_forward.1
= control target key start
LH: loop header
LB: loop body
LE: loop exit
PB: predicated region body
PF: predicated region fallthrough
CT: control target
= control target key end

     0   :  { %s1391_s27 = smov 0   ;;  %s1791_s0 = inlined_call_operand.vmem [shape: f32[2,64], index: 0, kind: input, shape index: {}]   ;;  %s1792_s1 = inlined_call_operand.vmem [shape: f32[2,48,64], index: 1, kind: input, shape index: {}]   ;;  %s1793_s2 = inlined_call_operand.vmem [shape: f32[32,48], index: 2, kind: input, shape index: {}]   ;;  %s1794_s3 = inlined_call_operand.vmem [shape: f32[32,1], index: 3, kind: input, shape index: {}]   ;;  %s1795_s4 = inlined_call_operand.vmem [shape: f32[32,9], index: 4, kind: input, shape index: {}]   ;;  %s1796_s5 = inlined_call_operand.vmem [shape: f32[32,1], index: 5, kind: input, shape index: {}]   ;;  %s1797_s6 = inlined_call_operand.vmem [shape: f32[16,32], index: 6, kind: input, shape index: {}]   ;;  %s1798_s7 = inlined_call_operand.vmem [shape: f32[16,1], index: 7, kind: input, shape index: {}]   ;;  %s1799_s8 = inlined_call_operand.vmem [shape: f32[2,16,64], index: 8, kind: output, shape index: {}]  }
   0x1 LB: > { %s1199_s28 = sadd.s32 4294967295, %s1327_s27   ;;  %p1203_p0 = scmp.ge.s32.totalorder %s1327_s27, 1  ;;  %s1327_s27 = sphi %s1391_s27, %s18_s27  }
   0x2   : > { %p262_p1 = scmp.lt.s32.totalorder %s1327_s27, 3 }
   0x4   : > { %p263_p2 = pnand %p1203_p0, %p262_p1 }
   0x5   : > { %p296_p3 = scmp.lt.s32.totalorder (!%p263_p2), %s1199_s28, 1  ;;  %s1338_s17 = smov (!%p263_p2), 121  }
   0x6   : > { %266 = sbr.rel (%p263_p2) target bundleno = 834 (0x342), region = 52  ;;  %s1340_s18 = smov (!%p263_p2), 120  }
   0x7   : > { %s1341_s19 = smov (!%p263_p2), 112   ;;  %s1342_s22 = smov (!%p263_p2), 119  }
   0x8   : > { %s1343_s11 = smov (!%p263_p2), 127   ;;  %s1344_s12 = smov (!%p263_p2), 126  }
   0x9   : > { %s1345_s13 = smov (!%p263_p2), 9  }
   0xb   : > { %v317_v0 = vld [vmem:[%s1794_s3 + $0x8] sm:$0xff]  ;;  %v1329_v1 = vmov 0   ;;  %v306_v2 = vld [vmem:[%s1793_s2] sm:$0xff]  ;;  %vm340_vm0 = vcmask 392192   ;;  %s1801_s28 = smov (!%p296_p3, %s1199_s28), 1  ;;  %v319_v4 = vld [vmem:[%s1794_s3 + $0x18] sm:$0xff] }
   0xc   : > { %1290 = vset.pattern.permute.xlu1 %v1329_v1  ;;  %1289 = vset.pattern.permute.xlu0 %v1329_v1  ;;  %v316_v3 = vld [vmem:[%s1794_s3] sm:$0xff]  ;;  %s1263_s15 = smul.u32 48, %s1801_s28  ;;  %v318_v5 = vld [vmem:[%s1794_s3 + $0x10] sm:$0xff]  ;;  %v1426_v8 = vld [vmem:[%s1795_s4 + $0x18] sm:$0xff]  ;;  %v1330_v10 = vmov 5   ;;  %v1331_v12 = vmov 7  }
   0xd   : > { %327 = vperm.xlu1 %1290, %v317_v0   ;;  %1246 = vmatprep.mubr.msk.f32.mxu0 %vm340_vm0, %v306_v2  ;;  %v1432_v13 = vld [vmem:[%s1795_s4 + $0x10] sm:$0xff]  ;;  %v1332_v15 = vmov 4   ;;  %v307_v17 = vld [vmem:[%s1793_s2 + $0x8] sm:$0xff]  ;;  %v309_v19 = vld [vmem:[%s1793_s2 + $0x18] sm:$0xff]  ;;  %v1333_v21 = vmov 8   ;;  %v1334_v23 = vmov 1  }
   0xe   : > { %337 = vperm.xlu0 %1289, %v319_v4   ;;  %s300_s20 = scalar_lea.vmem %s1792_s1, %s1263_s15  ;;  %v308_v18 = vld [vmem:[%s1793_s2 + $0x10] sm:$0xff]  ;;  %v1452_v20 = vld [vmem:[%s1795_s4 + $0x8] sm:$0xff]  ;;  %v1460_v22 = vld [vmem:[%s1795_s4] sm:$0xff]  ;;  %v1335_v24 = vmov 3   ;;  %v1336_v25 = vmov 6   ;;  %v1337_v26 = vmov 2  }
   0xf   : > { %v315_v6 = vld [vmem:[%s300_s20 + $0x28] sm:$0xff]  ;;  %v314_v7 = vld [vmem:[%s300_s20 + $0x20] sm:$0xff]  ;;  %v313_v9 = vld [vmem:[%s300_s20 + $0x18] sm:$0xff]  ;;  %vm450_vm1 = vcmask 1048064   ;;  %vm452_vm2 = vcmask 523264   ;;  %v1339_v28 = vmov 0.0  }
  0x10   : > { %1234 = vmatprep.subr.mxu0 %v315_v6  ;;  %v312_v11 = vld [vmem:[%s300_s20 + $0x10] sm:$0xff]  ;;  %v311_v14 = vld [vmem:[%s300_s20 + $0x8] sm:$0xff]  ;;  %v310_v16 = vld [vmem:[%s300_s20] sm:$0xff]  ;;  %454 = vst.msk [vmem:[#allocation2 + $0x20] sm:$0xff] %vm450_vm1, %v1339_v28  ;;  %vm552_vm3 = vcmask 982016   ;;  %vm883_vm4 = vcmask 1039360  }
  0x11   : > { %322 = vperm.xlu1 %1290, %v316_v3   ;;  %1235 = vmatpush3.msra.mxu0 %v315_v6  ;;  %v1212_v27 = vld [vmem:[%s1791_s0 + $0x1] ss:$0 sm:$0xff]  ;;  %451 = vst.msk [vmem:[#allocation2 + $0x8] sm:$0xff] %vm450_vm1, %v1339_v28  ;;  %456 = vst.msk [vmem:[#allocation2 + $0x38] sm:$0xff] %vm450_vm1, %v1339_v28  ;;  %vm944_vm5 = vcmask 1031168   ;;  %vm1060_vm6 = vcmask 261120  }
  0x12   : > { %332 = vperm.xlu0 %1289, %v318_v5   ;;  %1236 = vmatprep.subr.mxu0 %v314_v7  ;;  %458 = vst.msk [vmem:[#allocation2 + $0x50] sm:$0xff] %vm450_vm1, %v1339_v28  ;;  %vm1051_vm7 = vcmask 72704  }
  0x13   : > { %1237 = vmatpush3.msra.mxu0 %v314_v7 }
  0x14   : > { %1238 = vmatprep.subr.mxu0 %v313_v9 }
  0x15   : > { %1291 = vset.pattern.permute.xlu1 %v1330_v10  ;;  %1239 = vmatpush3.msra.mxu0 %v313_v9 }
  0x16   : > { %766 = vperm.xlu1 %1291, %v1426_v8   ;;  %1293 = vset.pattern.permute.xlu0 %v1331_v12 }
  0x17   : > { %698 = vperm.xlu0 %1293, %v1426_v8   ;;  %1240 = vmatprep.subr.mxu0 %v312_v11 }
  0x18   : > { %1241 = vmatpush3.msra.mxu0 %v312_v11 }
  0x19   : > { %1242 = vmatprep.subr.mxu0 %v311_v14 }
  0x1a   : > { %1292 = vset.pattern.permute.xlu1 %v1332_v15  ;;  %1243 = vmatpush3.msra.mxu0 %v311_v14 }
  0x1b   : > { %650 = vperm.xlu1 %1292, %v1432_v13   ;;  %1294 = vset.pattern.permute.xlu0 %v1332_v15 }
  0x1c   : > { %1244 = vmatprep.subr.mxu0 %v310_v16  ;;  %654 = vperm.xlu0 %1294, %v1426_v8  }
  0x1d   : > { %1245 = vmatpush3.msra.mxu0 %v310_v16 }
  0x1e   : > { %1247 = vmatmul.mubr.msk.f32.vlgmr.msra.gmra.mxu0 %vm340_vm0, %v307_v17 }
  0x1f   : > { %1295 = vset.pattern.permute.xlu1 %v1330_v10  ;;  %1249 = vmatprep.mubr.msk.f32.mxu0 %vm340_vm0, %v308_v18 }
  0x20   : > { %762 = vperm.xlu1 %1295, %v1432_v13   ;;  %646 = vperm.xlu0 %1294, %v1452_v20  }
  0x22   : > { %1250 = vmatmul.mubr.msk.f32.gmra.mxu0 %vm340_vm0, %v309_v19 }
  0x24   : > { %1296 = vset.pattern.permute.xlu1 %v1333_v21  ;;  %1301 = vset.pattern.permute.xlu0 %v1330_v10 }
  0x25   : > { %810 = vperm.xlu1 %1296, %v1426_v8   ;;  %754 = vperm.xlu0 %1301, %v1460_v22  }
  0x29   : > { %1297 = vset.pattern.permute.xlu1 %v1331_v12  ;;  %1302 = vset.pattern.permute.xlu0 %v1333_v21 }
  0x2a   : > { %694 = vperm.xlu1 %1297, %v1432_v13   ;;  %806 = vperm.xlu0 %1302, %v1432_v13  }
  0x2e   : > { %1298 = vset.pattern.permute.xlu1 %v1330_v10  ;;  %798 = vperm.xlu0 %1302, %v1460_v22  }
  0x2f   : > { %758 = vperm.xlu1 %1298, %v1452_v20  }
  0x32   : > { %1306 = vset.pattern.permute.xlu0 %v1334_v23 }
  0x33   : > { %1299 = vset.pattern.permute.xlu1 %v1332_v15  ;;  %630 = vperm.xlu0 %1306, %v1426_v8  }
  0x34   : > { %642 = vperm.xlu1 %1299, %v1460_v22  }
  0x37   : > { %1309 = vset.pattern.permute.xlu0 %v1335_v24 }
  0x38   : > { %1300 = vset.pattern.permute.xlu1 %v1331_v12  ;;  %509 = vperm.xlu0 %1309, %v1452_v20  }
  0x39   : > { %690 = vperm.xlu1 %1300, %v1452_v20  }
  0x3c   : > { %1312 = vset.pattern.permute.xlu0 %v1336_v25 }
  0x3d   : > { %1303 = vset.pattern.permute.xlu1 %v1333_v21  ;;  %582 = vperm.xlu0 %1312, %v1432_v13  }
  0x3e   : > { %802 = vperm.xlu1 %1303, %v1452_v20  }
  0x41   : > { %1315 = vset.pattern.permute.xlu0 %v1337_v26 }
  0x42   : > { %1304 = vset.pattern.permute.xlu1 %v1331_v12  ;;  %734 = vperm.xlu0 %1315, %v1452_v20  }
  0x43   : > { %686 = vperm.xlu1 %1304, %v1460_v22  }
  0x46   : > { %730 = vperm.xlu0 %1315, %v1460_v22  }
  0x47   : > { %1305 = vset.pattern.permute.xlu1 %v1335_v24 }
  0x48   : > { %517 = vperm.xlu1 %1305, %v1426_v8  }
  0x4a   : > { %909 = vrot.lane.b32.xlu0 %v1212_v27, %s1338_s17 }
  0x4b   : > { %1320 = vset.pattern.permute.xlu0 %v1329_v1 }
  0x4c   : > { %513 = vperm.xlu1 %1305, %v1432_v13  }
  0x4e   : > { %488 = vperm.xlu0 %1320, %v1432_v13  }
  0x50   : > { %1307 = vset.pattern.permute.xlu1 %v1337_v26 }
  0x51   : > { %742 = vperm.xlu1 %1307, %v1426_v8  }
  0x55   : > { %1308 = vset.pattern.permute.xlu1 %v1336_v25 }
  0x56   : > { %586 = vperm.xlu1 %1308, %v1426_v8  }
  0x5a   : > { %1310 = vset.pattern.permute.xlu1 %v1334_v23 }
  0x5b   : > { %626 = vperm.xlu1 %1310, %v1432_v13  }
  0x5f   : > { %1311 = vset.pattern.permute.xlu1 %v1337_v26 }
  0x60   : > { %738 = vperm.xlu1 %1311, %v1432_v13  }
  0x64   : > { %1313 = vset.pattern.permute.xlu1 %v1335_v24 }
  0x65   : > { %505 = vperm.xlu1 %1313, %v1460_v22  }
  0x69   : > { %1314 = vset.pattern.permute.xlu1 %v1334_v23 }
  0x6a   : > { %622 = vperm.xlu1 %1314, %v1452_v20  }
  0x6e   : > { %1316 = vset.pattern.permute.xlu1 %v1336_v25 }
  0x6f   : > { %578 = vperm.xlu1 %1316, %v1452_v20  }
  0x73   : > { %1317 = vset.pattern.permute.xlu1 %v1334_v23 }
  0x74   : > { %618 = vperm.xlu1 %1317, %v1460_v22  }
  0x78   : > { %1318 = vset.pattern.permute.xlu1 %v1336_v25 }
  0x79   : > { %574 = vperm.xlu1 %1318, %v1460_v22  }
  0x7d   : > { %1319 = vset.pattern.permute.xlu1 %v1329_v1 }
  0x7e   : > { %493 = vperm.xlu1 %1319, %v1426_v8  }
  0x82   : > { %483 = vperm.xlu1 %1319, %v1452_v20  }
  0x88   : > { %v328_v29 = vpop.permute.xlu1 %327 }
  0x89   : > { %v338_v45 = vpop.permute.xlu0 %337 }
  0x8c   : > { %v323_v30 = vpop.permute.xlu1 %322 }
  0x8d   : > { %v333_v47 = vpop.permute.xlu0 %332 }
  0x91   : > { %v1495_v31 = vpop.permute.xlu1 %766 }
  0x92   : > { %v699_v49 = vpop.permute.xlu0 %698 }
  0x96   : > { %v1497_v32 = vpop.permute.xlu1 %650 }
  0x97   : > { %v655_v57 = vpop.permute.xlu0 %654 }
  0x9b   : > { %v1499_v33 = vpop.permute.xlu1 %762  ;;  %v647_v6 = vpop.permute.xlu0 %646 }
  0xa0   : > { %v1501_v34 = vpop.permute.xlu1 %810  ;;  %v755_v12 = vpop.permute.xlu0 %754 }
  0xa5   : > { %v1503_v35 = vpop.permute.xlu1 %694  ;;  %v807_v24 = vpop.permute.xlu0 %806 }
  0xaa   : > { %v759_v36 = vpop.permute.xlu1 %758 }
  0xaf   : > { %v643_v37 = vpop.permute.xlu1 %642 }
  0xb4   : > { %v691_v38 = vpop.permute.xlu1 %690 }
  0xb9   : > { %v1505_v39 = vpop.permute.xlu1 %802 }
  0xbe   : > { %v687_v40 = vpop.permute.xlu1 %686 }
  0xc3   : > { %v1507_v41 = vpop.permute.xlu1 %517 }
  0xc7   : > { %v1509_v42 = vpop.permute.xlu1 %513 }
  0xcc   : > { %v1511_v43 = vpop.permute.xlu1 %742 }
  0xd1   : > { %v1513_v44 = vpop.permute.xlu1 %586 }
  0xd6   : > { %v1515_v46 = vpop.permute.xlu1 %626 }
  0xdb   : > { %v1517_v48 = vpop.permute.xlu1 %738 }
  0xde   : > { %v1248_v50 = vpop.f32.mrf.mxu0 }
  0xdf   : > { %v425_v51 = vadd.f32 %v1248_v50, %v328_v29  ;;  %v799_v29 = vpop.permute.xlu0 %798 }
  0xe0   : > { %v1519_v52 = vpop.permute.xlu1 %505  ;;  %v419_v53 = vpop.f32.mrf.mxu0 }
  0xe1   : > { %v439_v54 = vmax.f32 %v425_v51, 0.0  ;;  %v420_v55 = vadd.f32 %v419_v53, %v323_v30 }
  0xe2   : > { %v1251_v56 = vpop.f32.mrf.mxu0 }
  0xe3   : > { %v443_v58 = vmin.f32 %v439_v54, 6.0  ;;  %v438_v59 = vmax.f32 %v420_v55, 0.0  ;;  %v435_v60 = vadd.f32 %v1251_v56, %v338_v45  ;;  %v520_v54 = vmul.f32 0.0, %v1519_v52  ;;  %v967_v55 = vld [vmem:[%s1796_s5 + $0x10] sm:$0xff] }
  0xe4   : > { %v429_v61 = vpop.f32.mrf.mxu0 }
  0xe5   : > { %v1521_v62 = vpop.permute.xlu1 %622  ;;  %461 = vst.msk [vmem:[#allocation2 + $0x20] sm:$0xff] %vm452_vm2, %v443_v58  ;;  %v442_v63 = vmin.f32 %v438_v59, 6.0  ;;  %v441_v0 = vmax.f32 %v435_v60, 0.0  ;;  %v430_v1 = vadd.f32 %v429_v61, %v333_v47  ;;  %v526_v47 = vmul.f32 0.0, %v1507_v41  ;;  %v965_v59 = vld [vmem:[%s1796_s5] sm:$0xff] }
  0xe7   : > { %460 = vst.msk [vmem:[#allocation2 + $0x8] sm:$0xff] %vm452_vm2, %v442_v63  ;;  %v445_v2 = vmin.f32 %v441_v0, 6.0  ;;  %v440_v3 = vmax.f32 %v430_v1, 0.0 }
  0xe9   : > { %463 = vst.msk [vmem:[#allocation2 + $0x50] sm:$0xff] %vm452_vm2, %v445_v2  ;;  %v444_v4 = vmin.f32 %v440_v3, 6.0 }
  0xea   : > { %v1526_v5 = vpop.permute.xlu1 %578 }
  0xeb   : > { %462 = vst.msk [vmem:[#allocation2 + $0x38] sm:$0xff] %vm452_vm2, %v444_v4 }
  0xec   : > { %v1529_v7 = vld [vmem:[#allocation2 + $0x20] sm:$0xff] }
  0xed   : > { %v1533_v8 = vmul.f32 %v1521_v62, %v1529_v7  ;;  %v658_v9 = vmul.f32 %v647_v6, %v1529_v7  ;;  %v770_v15 = vmul.f32 %v759_v36, %v1529_v7  ;;  %v702_v20 = vmul.f32 %v691_v38, %v1529_v7 }
  0xee   : > { %v1536_v10 = vld [vmem:[#allocation2 + $0x8] sm:$0xff]  ;;  %v814_v28 = vmul.f32 %v1505_v39, %v1529_v7  ;;  %v590_v56 = vmul.f32 %v1526_v5, %v1529_v7  ;;  %v635_v6 = vmul.f32 0.0, %v1521_v62 }
  0xef   : > { %v1538_v11 = vpop.permute.xlu1 %618  ;;  %667 = vrot.lane.b32.xlu0 %v658_v9, %s1340_s18  ;;  %v657_v13 = vmul.f32 %v643_v37, %v1536_v10  ;;  %v769_v19 = vmul.f32 %v755_v12, %v1536_v10  ;;  %v701_v26 = vmul.f32 %v687_v40, %v1536_v10  ;;  %v813_v36 = vmul.f32 %v799_v29, %v1536_v10 }
  0xf0   : > { %v1542_v14 = vld [vmem:[#allocation2 + $0x50] sm:$0xff] }
  0xf1   : > { %665 = vrot.lane.b32.xlu1 %v657_v13, %s1340_s18  ;;  %v1550_v17 = vmul.f32 %v1511_v43, %v1542_v14  ;;  %v772_v30 = vmul.f32 %v1495_v31, %v1542_v14  ;;  %v704_v37 = vmul.f32 %v699_v49, %v1542_v14  ;;  %v660_v38 = vmul.f32 %v655_v57, %v1542_v14  ;;  %v1603_v49 = vpop.permute.xlu0 %630  ;;  %v966_v57 = vld [vmem:[%s1796_s5 + $0x8] sm:$0xff] }
  0xf2   : > { %v1546_v16 = vld [vmem:[#allocation2 + $0x38] sm:$0xff]  ;;  %v816_v39 = vmul.f32 %v1501_v34, %v1542_v14  ;;  %v592_v50 = vmul.f32 %v1513_v44, %v1542_v14  ;;  %v521_v44 = vmul.f32 %v1519_v52, %v1536_v10 }
  0xf3   : > { %779 = vrot.lane.b32.xlu0 %v770_v15, %s1340_s18  ;;  %v1559_v21 = vmul.f32 %v1515_v46, %v1546_v16  ;;  %v1563_v23 = vmul.f32 %v1517_v48, %v1546_v16  ;;  %v659_v31 = vmul.f32 %v1497_v32, %v1546_v16  ;;  %v703_v40 = vmul.f32 %v1503_v35, %v1546_v16 }
  0xf4   : > { %v1552_v18 = vpop.permute.xlu1 %574  ;;  %v771_v45 = vmul.f32 %v1499_v33, %v1546_v16  ;;  %v815_v34 = vmul.f32 %v807_v24, %v1546_v16  ;;  %v524_v32 = vmul.f32 0.0, %v1509_v42  ;;  %v527_v33 = vmul.f32 %v1507_v41, %v1542_v14  ;;  %v968_v41 = vld [vmem:[%s1796_s5 + $0x18] sm:$0xff] }
  0xf5   : > { %777 = vrot.lane.b32.xlu1 %v769_v19, %s1340_s18  ;;  %v510_v35 = vpop.permute.xlu0 %509  ;;  %v589_v52 = vmul.f32 %v1552_v18, %v1536_v10  ;;  %v525_v58 = vmul.f32 %v1509_v42, %v1546_v16  ;;  %v633_v18 = vmul.f32 0.0, %v1538_v11  ;;  %v634_v24 = vmul.f32 %v1538_v11, %v1536_v10 }
  0xf6   : > { %v522_v51 = vmul.f32 0.0, %v510_v35  ;;  %v523_v53 = vmul.f32 %v510_v35, %v1529_v7  ;;  %v640_v35 = vmul.f32 %v1603_v49, %v1542_v14 }
  0xf7   : > { %711 = vrot.lane.b32.xlu0 %v702_v20, %s1341_s19 }
  0xf9   : > { %v1567_v25 = vpop.permute.xlu1 %493  ;;  %709 = vrot.lane.b32.xlu1 %v701_v26, %s1341_s19  ;;  %v583_v60 = vpop.permute.xlu0 %582 }
  0xfa   : > { %v1572_v27 = vmul.f32 %v1567_v25, %v1542_v14  ;;  %v591_v61 = vmul.f32 %v583_v60, %v1546_v16 }
  0xfb   : > { %823 = vrot.lane.b32.xlu0 %v814_v28, %s1341_s19 }
  0xfd   : > { %783 = vrot.lane.b32.xlu1 %v772_v30, %s1340_s18  ;;  %v735_v63 = vpop.permute.xlu0 %734  ;;  %v1654_v42 = vpop.permute.xlu1 %483 }
  0xfe   : > { %v747_v15 = vmul.f32 0.0, %v735_v63  ;;  %v748_v20 = vmul.f32 %v735_v63, %v1529_v7 }
  0xff   : > { %821 = vrot.lane.b32.xlu0 %v813_v36, %s1341_s19 }
 0x101   : > { %715 = vrot.lane.b32.xlu1 %v704_v37, %s1341_s19  ;;  %v1648_v0 = vpop.permute.xlu0 %730 }
 0x103   : > { %671 = vrot.lane.b32.xlu0 %v660_v38, %s1340_s18 }
 0x105   : > { %827 = vrot.lane.b32.xlu1 %v816_v39, %s1341_s19  ;;  %v1650_v1 = vpop.permute.xlu0 %909 }
 0x107   : > { %669 = vrot.lane.b32.xlu0 %v659_v31, %s1340_s18 }
 0x109   : > { %713 = vrot.lane.b32.xlu1 %v703_v40, %s1341_s19  ;;  %v1652_v2 = vpop.permute.xlu0 %488 }
 0x10b   : > { %781 = vrot.lane.b32.xlu0 %v771_v45, %s1340_s18 }
 0x10d   : > { %825 = vrot.lane.b32.xlu1 %v815_v34, %s1341_s19 }
 0x10f   : > { %548 = vrot.lane.b32.xlu0 %v526_v47, %s1340_s18 }
 0x111   : > { %478 = vperm.xlu1 %1319, %v1460_v22   ;;  %v1211_v22 = vld [vmem:[%s1791_s0] ss:$0 sm:$0xff] }
 0x113   : > { %544 = vrot.lane.b32.xlu0 %v524_v32, %s1340_s18  ;;  %v639_v32 = vmul.f32 0.0, %v1603_v49  ;;  %v749_v49 = vmul.f32 0.0, %v1517_v48 }
 0x115   : > { %550 = vrot.lane.b32.xlu1 %v527_v33, %s1340_s18 }
 0x117   : > { %603 = vrot.lane.b32.xlu0 %v592_v50, %s1341_s19 }
 0x119   : > { %540 = vrot.lane.b32.xlu1 %v522_v51, %s1340_s18 }
 0x11b   : > { %542 = vrot.lane.b32.xlu0 %v523_v53, %s1340_s18 }
 0x11d   : > { %536 = vrot.lane.b32.xlu1 %v520_v54, %s1340_s18  ;;  %v637_v54 = vmul.f32 0.0, %v1515_v46 }
 0x11f   : > { %848 = vrot.lane.b32.xlu0 %v1211_v22, %s1342_s22  ;;  %s1217_s22 = sshll.u32 %s1801_s28, 4 }
 0x120   : > { %s305_s25 = scalar_lea.vmem %s1799_s8, %s1217_s22 }
 0x121   : > { %986 = vperm.xlu1 %1319, %v968_v41  }
 0x123   : > { %538 = vrot.lane.b32.xlu0 %v521_v44, %s1340_s18 }
 0x125   : > { %981 = vperm.xlu1 %1319, %v967_v55   ;;  %v751_v55 = vmul.f32 0.0, %v1511_v43 }
 0x127   : > { %599 = vrot.lane.b32.xlu0 %v590_v56, %s1341_s19 }
 0x129   : > { %976 = vperm.xlu1 %1319, %v966_v57  }
 0x12b   : > { %597 = vrot.lane.b32.xlu0 %v589_v52, %s1341_s19 }
 0x12d   : > { %546 = vrot.lane.b32.xlu1 %v525_v58, %s1340_s18 }
 0x12f   : > { %971 = vperm.xlu0 %1320, %v965_v59  }
 0x131   : > { %601 = vrot.lane.b32.xlu1 %v591_v61, %s1341_s19 }
 0x161   : > { %v668_v3 = vpop.permute.xlu0 %667 }
 0x162   : > { %v679_v9 = vadd.f32 %v668_v3, %v635_v6  ;;  %v680_v12 = vadd.f32 %v668_v3, %v1533_v8 }
 0x163   : > { %v666_v4 = vpop.permute.xlu1 %665 }
 0x164   : > { %v677_v29 = vadd.f32 %v666_v4, %v633_v18  ;;  %v678_v30 = vadd.f32 %v666_v4, %v634_v24 }
 0x165   : > { %v780_v5 = vpop.permute.xlu0 %779 }
 0x166   : > { %v791_v36 = vadd.f32 %v780_v5, %v747_v15  ;;  %v792_v62 = vadd.f32 %v780_v5, %v748_v20 }
 0x167   : > { %v1658_v13 = vpop.permute.xlu1 %777 }
 0x169   : > { %v712_v19 = vpop.permute.xlu0 %711 }
 0x16a   : > { %v723_v26 = vadd.f32 %v712_v19, %v679_v9  ;;  %v724_v28 = vadd.f32 %v712_v19, %v680_v12 }
 0x16b   : > { %v710_v37 = vpop.permute.xlu1 %709 }
 0x16c   : > { %871 = vrot.lane.b32.xlu1 %v723_v26, %s1343_s11  ;;  %873 = vrot.lane.b32.xlu0 %v724_v28, %s1343_s11  ;;  %v721_v38 = vadd.f32 %v710_v37, %v677_v29  ;;  %v722_v39 = vadd.f32 %v710_v37, %v678_v30 }
 0x16d   : > { %v824_v8 = vpop.permute.xlu0 %823 }
 0x16e   : > { %v835_v31 = vadd.f32 %v824_v8, %v791_v36  ;;  %v836_v40 = vadd.f32 %v824_v8, %v792_v62 }
 0x16f   : > { %v784_v45 = vpop.permute.xlu1 %783 }
 0x170   : > { %869 = vrot.lane.b32.xlu1 %v722_v39, %s1343_s11  ;;  %867 = vrot.lane.b32.xlu0 %v721_v38, %s1343_s11  ;;  %v914_v47 = vmul.f32 %v1650_v1, %v835_v31  ;;  %v915_v34 = vmul.f32 %v1650_v1, %v836_v40  ;;  %v795_v58 = vadd.f32 %v784_v45, %v751_v55 }
 0x171   : > { %v822_v11 = vpop.permute.xlu0 %821  ;;  %v796_v14 = vadd.f32 %v784_v45, %v1550_v17  ;;  %v746_v17 = vmul.f32 %v1648_v0, %v1536_v10 }
 0x173   : > { %v716_v33 = vpop.permute.xlu1 %715 }
 0x174   : > { %934 = vrot.lane.b32.xlu1 %v915_v34, %s1344_s12  ;;  %932 = vrot.lane.b32.xlu0 %v914_v47, %s1344_s12 }
 0x175   : > { %v672_v50 = vpop.permute.xlu0 %671 }
 0x176   : > { %v683_v51 = vadd.f32 %v672_v50, %v639_v32  ;;  %v684_v53 = vadd.f32 %v672_v50, %v640_v35  ;;  %v498_v50 = vmul.f32 0.0, %v1654_v42 }
 0x177   : > { %v828_v44 = vpop.permute.xlu1 %827 }
 0x178   : > { %v727_v22 = vadd.f32 %v716_v33, %v683_v51  ;;  %v728_v41 = vadd.f32 %v716_v33, %v684_v53  ;;  %v839_v46 = vadd.f32 %v828_v44, %v795_v58  ;;  %v840_v60 = vadd.f32 %v828_v44, %v796_v14 }
 0x179   : > { %v670_v56 = vpop.permute.xlu0 %669  ;;  %v499_v33 = vmul.f32 %v1654_v42, %v1529_v7 }
 0x17a   : > { %v681_v57 = vadd.f32 %v670_v56, %v637_v54  ;;  %v682_v52 = vadd.f32 %v670_v56, %v1559_v21  ;;  %879 = vrot.lane.b32.xlu1 %v727_v22, %s1343_s11  ;;  %881 = vrot.lane.b32.xlu0 %v728_v41, %s1343_s11  ;;  %v745_v21 = vmul.f32 0.0, %v1648_v0  ;;  %v918_v48 = vmul.f32 %v1650_v1, %v839_v46 }
 0x17b   : > { %v714_v59 = vpop.permute.xlu1 %713  ;;  %v919_v6 = vmul.f32 %v1650_v1, %v840_v60 }
 0x17c   : > { %v725_v61 = vadd.f32 %v714_v59, %v681_v57  ;;  %v726_v63 = vadd.f32 %v714_v59, %v682_v52  ;;  %v789_v15 = vadd.f32 %v1658_v13, %v745_v21 }
 0x17d   : > { %v782_v3 = vpop.permute.xlu0 %781 }
 0x17e   : > { %v793_v43 = vadd.f32 %v782_v3, %v749_v49  ;;  %v794_v4 = vadd.f32 %v782_v3, %v1563_v23  ;;  %875 = vrot.lane.b32.xlu1 %v725_v61, %s1343_s11  ;;  %877 = vrot.lane.b32.xlu0 %v726_v63, %s1343_s11  ;;  %v790_v23 = vadd.f32 %v1658_v13, %v746_v17  ;;  %v502_v63 = vmul.f32 0.0, %v1567_v25 }
 0x17f   : > { %v826_v5 = vpop.permute.xlu1 %825  ;;  %v833_v18 = vadd.f32 %v822_v11, %v789_v15 }
 0x180   : > { %v837_v9 = vadd.f32 %v826_v5, %v793_v43  ;;  %v838_v12 = vadd.f32 %v826_v5, %v794_v4  ;;  %v834_v19 = vadd.f32 %v822_v11, %v790_v23  ;;  %v501_v23 = vmul.f32 %v1652_v2, %v1546_v16 }
 0x181   : > { %v912_v24 = vmul.f32 %v1650_v1, %v833_v18  ;;  %v549_v28 = vpop.permute.xlu0 %548 }
 0x182   : > { %940 = vrot.lane.b32.xlu1 %v918_v48, %s1344_s12  ;;  %942 = vrot.lane.b32.xlu0 %v919_v6, %s1344_s12  ;;  %v916_v20 = vmul.f32 %v1650_v1, %v837_v9  ;;  %v917_v0 = vmul.f32 %v1650_v1, %v838_v12  ;;  %v913_v26 = vmul.f32 %v1650_v1, %v834_v19  ;;  %v500_v12 = vmul.f32 0.0, %v1652_v2 }
 0x185   : > { %v545_v30 = vpop.permute.xlu0 %544 }
 0x186   : > { %936 = vrot.lane.b32.xlu1 %v916_v20, %s1344_s12  ;;  %938 = vrot.lane.b32.xlu0 %v917_v0, %s1344_s12 }
 0x189   : > { %v604_v62 = vpop.permute.xlu0 %603 }
 0x18a   : > { %928 = vrot.lane.b32.xlu1 %v912_v24, %s1344_s12  ;;  %930 = vrot.lane.b32.xlu0 %v913_v26, %s1344_s12 }
 0x18c   : > { %v1702_v13 = vpop.permute.xlu1 %478 }
 0x18d   : > { %v543_v8 = vpop.permute.xlu0 %542  ;;  %v497_v0 = vmul.f32 %v1702_v13, %v1536_v10 }
 0x18e   : > { %v568_v51 = vadd.f32 %v543_v8, %v499_v33 }
 0x190   : > { %v551_v29 = vpop.permute.xlu1 %550 }
 0x191   : > { %v1706_v39 = vpop.permute.xlu0 %848  ;;  %v556_v60 = vsel %vm552_vm3, %v549_v28, %v551_v29  ;;  %v572_v43 = vadd.f32 %v551_v29, %v1572_v27 }
 0x192   : > { %v571_v21 = vadd.f32 %v556_v60, %v502_v63 }
 0x193   : > { %v616_v18 = vadd.f32 %v604_v62, %v572_v43 }
 0x194   : > { %v541_v36 = vpop.permute.xlu1 %540  ;;  %v615_v25 = vadd.f32 %v604_v62, %v571_v21 }
 0x195   : > { %v539_v1 = vpop.permute.xlu0 %538  ;;  %v554_v35 = vsel %vm552_vm3, %v541_v36, %v543_v8  ;;  %v858_v16 = vmul.f32 %v1706_v39, %v616_v18 }
 0x196   : > { %v567_v53 = vadd.f32 %v554_v35, %v498_v50  ;;  %v566_v36 = vadd.f32 %v539_v1, %v497_v0  ;;  %v857_v8 = vmul.f32 %v1706_v39, %v615_v25  ;;  %v1016_v25 = vld [vmem:[%s1798_s7 + $0x8] sm:$0xff] }
 0x198   : > { %v537_v37 = vpop.permute.xlu1 %536 }
 0x199   : > { %v600_v45 = vpop.permute.xlu0 %599  ;;  %v553_v28 = vsel %vm552_vm3, %v537_v37, %v539_v1 }
 0x19a   : > { %v612_v41 = vadd.f32 %v600_v45, %v568_v51  ;;  %v611_v44 = vadd.f32 %v600_v45, %v567_v53 }
 0x19c   : > { %v1704_v38 = vpop.permute.xlu1 %986  ;;  %v854_v57 = vmul.f32 %v1706_v39, %v612_v41  ;;  %v853_v7 = vmul.f32 %v1706_v39, %v611_v44 }
 0x19d   : > { %v1710_v47 = vpop.permute.xlu0 %597 }
 0x1a0   : > { %v1708_v31 = vpop.permute.xlu1 %981 }
 0x1a4   : > { %v977_v40 = vpop.permute.xlu1 %976 }
 0x1a8   : > { %v547_v11 = vpop.permute.xlu1 %546 }
 0x1a9   : > { %v555_v5 = vsel %vm552_vm3, %v545_v30, %v547_v11  ;;  %v570_v27 = vadd.f32 %v547_v11, %v501_v23  ;;  %v496_v30 = vmul.f32 0.0, %v1702_v13  ;;  %v610_v11 = vadd.f32 %v1710_v47, %v566_v36 }
 0x1aa   : > { %v1712_v34 = vpop.permute.xlu0 %971  ;;  %v569_v20 = vadd.f32 %v555_v5, %v500_v12 }
 0x1ab   : > { %v565_v45 = vadd.f32 %v553_v28, %v496_v30  ;;  %v852_v41 = vmul.f32 %v1706_v39, %v610_v11 }
 0x1ac   : > { %v602_v32 = vpop.permute.xlu1 %601 }
 0x1ad   : > { %v614_v29 = vadd.f32 %v602_v32, %v570_v27  ;;  %v613_v62 = vadd.f32 %v602_v32, %v569_v20  ;;  %v609_v13 = vadd.f32 %v1710_v47, %v565_v45 }
 0x1af   : > { %v856_v37 = vmul.f32 %v1706_v39, %v614_v29  ;;  %v855_v1 = vmul.f32 %v1706_v39, %v613_v62 }
 0x1de   : > { %v872_v54 = vpop.permute.xlu1 %871  ;;  %v874_v22 = vpop.permute.xlu0 %873 }
 0x1df   : > { %v885_v52 = vsel %vm883_vm4, %v872_v54, %v874_v22  ;;  %v899_v58 = vadd.f32 %v874_v22, %v854_v57 }
 0x1e0   : > { %v898_v42 = vadd.f32 %v885_v52, %v853_v7 }
 0x1e2   : > { %v1718_v55 = vpop.permute.xlu1 %869  ;;  %v1720_v56 = vpop.permute.xlu0 %867 }
 0x1e3   : > { %v897_v60 = vadd.f32 %v1718_v55, %v852_v41 }
 0x1e6   : > { %v935_v14 = vpop.permute.xlu1 %934  ;;  %v933_v49 = vpop.permute.xlu0 %932 }
 0x1e7   : > { %v960_v59 = vadd.f32 %v935_v14, %v899_v58  ;;  %v946_v46 = vsel %vm944_vm5, %v933_v49, %v935_v14  ;;  %v884_v58 = vsel %vm883_vm4, %v1720_v56, %v1718_v55  ;;  %v851_v49 = vmul.f32 %v1706_v39, %v609_v13 }
 0x1e8   : > { %v959_v61 = vadd.f32 %v946_v46, %v898_v42 }
 0x1e9   : > { %v992_v3 = vadd.f32 %v977_v40, %v960_v59 }
 0x1ea   : > { %v991_v4 = vadd.f32 %v977_v40, %v959_v61 }
 0x1eb   : > { %v1000_v17 = vmax.f32 %v992_v3, 0.0  ;;  %v896_v3 = vadd.f32 %v884_v58, %v851_v49 }
 0x1ec   : > { %v999_v48 = vmax.f32 %v991_v4, 0.0  ;;  %v880_v6 = vpop.permute.xlu1 %879  ;;  %v882_v9 = vpop.permute.xlu0 %881 }
 0x1ed   : > { %v1008_v15 = vmin.f32 %v1000_v17, 6.0  ;;  %v887_v2 = vsel %vm883_vm4, %v880_v6, %v882_v9  ;;  %v903_v40 = vadd.f32 %v882_v9, %v858_v16 }
 0x1ee   : > { %v1007_v19 = vmin.f32 %v999_v48, 6.0  ;;  %v902_v10 = vadd.f32 %v887_v2, %v857_v8  ;;  %v1014_v8 = vld [vmem:[%s1797_s6 + $0x8] sm:$0xff] }
 0x1ef   : > { %1041 = vrot.lane.b32.xlu0 %v1008_v15, %s1345_s13 }
 0x1f0   : > { %1039 = vrot.lane.b32.xlu1 %v1007_v19, %s1345_s13  ;;  %v876_v24 = vpop.permute.xlu1 %875  ;;  %v878_v26 = vpop.permute.xlu0 %877 }
 0x1f1   : > { %v886_v50 = vsel %vm883_vm4, %v876_v24, %v878_v26  ;;  %v901_v54 = vadd.f32 %v878_v26, %v856_v37 }
 0x1f2   : > { %v900_v44 = vadd.f32 %v886_v50, %v855_v1 }
 0x1f4   : > { %v941_v33 = vpop.permute.xlu1 %940  ;;  %v943_v35 = vpop.permute.xlu0 %942 }
 0x1f5   : > { %v948_v51 = vsel %vm944_vm5, %v941_v33, %v943_v35  ;;  %v964_v53 = vadd.f32 %v943_v35, %v903_v40 }
 0x1f6   : > { %v963_v32 = vadd.f32 %v948_v51, %v902_v10 }
 0x1f7   : > { %v996_v22 = vadd.f32 %v1704_v38, %v964_v53 }
 0x1f8   : > { %v995_v57 = vadd.f32 %v1704_v38, %v963_v32  ;;  %v937_v52 = vpop.permute.xlu1 %936  ;;  %v939_v7 = vpop.permute.xlu0 %938  ;;  %v1013_v38 = vld [vmem:[%s1797_s6] sm:$0xff] }
 0x1f9   : > { %v1004_v42 = vmax.f32 %v996_v22, 0.0  ;;  %v947_v47 = vsel %vm944_vm5, %v937_v52, %v939_v7  ;;  %v962_v14 = vadd.f32 %v939_v7, %v901_v54  ;;  %1260 = vmatprep.mubr.msk.f32.mxu1 %vm1060_vm6, %v1013_v38 }
 0x1fa   : > { %v1003_v59 = vmax.f32 %v995_v57, 0.0  ;;  %v961_v46 = vadd.f32 %v947_v47, %v900_v44 }
 0x1fb   : > { %v994_v61 = vadd.f32 %v1708_v31, %v962_v14  ;;  %v1012_v63 = vmin.f32 %v1004_v42, 6.0 }
 0x1fc   : > { %v1011_v56 = vmin.f32 %v1003_v59, 6.0  ;;  %v993_v43 = vadd.f32 %v1708_v31, %v961_v46  ;;  %v929_v4 = vpop.permute.xlu1 %928  ;;  %v931_v21 = vpop.permute.xlu0 %930 }
 0x1fd   : > { %v1002_v39 = vmax.f32 %v994_v61, 0.0  ;;  %v945_v17 = vsel %vm944_vm5, %v929_v4, %v931_v21  ;;  %v958_v55 = vadd.f32 %v931_v21, %v897_v60  ;;  %1049 = vrot.lane.b32.xlu0 %v1012_v63, %s1345_s13 }
 0x1fe   : > { %v1001_v5 = vmax.f32 %v993_v43, 0.0  ;;  %v957_v48 = vadd.f32 %v945_v17, %v896_v3  ;;  %1047 = vrot.lane.b32.xlu1 %v1011_v56, %s1345_s13 }
 0x1ff   : > { %v990_v6 = vadd.f32 %v1712_v34, %v958_v55  ;;  %v1010_v9 = vmin.f32 %v1002_v39, 6.0 }
 0x200   : > { %v1009_v12 = vmin.f32 %v1001_v5, 6.0  ;;  %v989_v31 = vadd.f32 %v1712_v34, %v957_v48  ;;  %v1015_v34 = vld [vmem:[%s1798_s7] sm:$0xff] }
 0x201   : > { %v998_v15 = vmax.f32 %v990_v6, 0.0  ;;  %1045 = vrot.lane.b32.xlu0 %v1010_v9, %s1345_s13 }
 0x202   : > { %v997_v23 = vmax.f32 %v989_v31, 0.0  ;;  %1043 = vrot.lane.b32.xlu1 %v1009_v12, %s1345_s13 }
 0x203   : > { %v1006_v18 = vmin.f32 %v998_v15, 6.0 }
 0x204   : > { %v1005_v19 = vmin.f32 %v997_v23, 6.0 }
 0x205   : > { %1037 = vrot.lane.b32.xlu0 %v1006_v18, %s1345_s13 }
 0x206   : > { %1035 = vrot.lane.b32.xlu1 %v1005_v19, %s1345_s13 }
 0x209   : > { %1024 = vperm.xlu0 %1320, %v1016_v25  }
 0x20a   : > { %1019 = vperm.xlu1 %1319, %v1015_v34  }
 0x261   : > { %v1042_v20 = vpop.permute.xlu0 %1041 }
 0x262   : > { %v1040_v27 = vpop.permute.xlu1 %1039 }
 0x263   : > { %v1053_v30 = vsel %vm1051_vm7, %v1040_v27, %v1042_v20 }
 0x26f   : > { %v1050_v0 = vpop.permute.xlu0 %1049 }
 0x270   : > { %v1048_v24 = vpop.permute.xlu1 %1047 }
 0x271   : > { %v1055_v26 = vsel %vm1051_vm7, %v1048_v24, %v1050_v0 }
 0x272   : > { %1252 = vmatprep.subr.mxu1 %v1055_v26 }
 0x273   : > { %1253 = vmatpush3.msra.mxu1 %v1055_v26  ;;  %v1046_v28 = vpop.permute.xlu0 %1045 }
 0x274   : > { %v1044_v29 = vpop.permute.xlu1 %1043 }
 0x275   : > { %v1054_v16 = vsel %vm1051_vm7, %v1044_v29, %v1046_v28 }
 0x276   : > { %1254 = vmatprep.subr.mxu1 %v1054_v16 }
 0x277   : > { %1255 = vmatpush3.msra.mxu1 %v1054_v16  ;;  %v1038_v2 = vpop.permute.xlu0 %1037 }
 0x278   : > { %v1036_v36 = vpop.permute.xlu1 %1035  ;;  %1256 = vmatprep.subr.mxu1 %v1053_v30 }
 0x279   : > { %1257 = vmatpush3.msra.mxu1 %v1053_v30  ;;  %v1052_v62 = vsel %vm1051_vm7, %v1036_v36, %v1038_v2 }
 0x27a   : > { %1258 = vmatprep.subr.mxu1 %v1052_v62 }
 0x27b   : > { %1259 = vmatpush3.msra.mxu1 %v1052_v62 }
 0x27c   : > { %1261 = vmatmul.mubr.msk.f32.vlgmr.msra.gmra.mxu1 %vm1060_vm6, %v1014_v8 }
 0x284   : > { %v1025_v40 = vpop.permute.xlu0 %1024 }
 0x285   : > { %v1020_v10 = vpop.permute.xlu1 %1019 }
 0x33c   : > { %v1262_v45 = vpop.f32.mrf.mxu1 }
 0x33d   : > { %v1139_v11 = vadd.f32 %v1262_v45, %v1025_v40 }
 0x33e   : > { %v1133_v33 = vpop.f32.mrf.mxu1 }
 0x33f   : > { %1143 = vst.msk [vmem:[%s305_s25 + $0x8] sm:$0xff] %vm452_vm2, %v1139_v11  ;;  %v1134_v35 = vadd.f32 %v1133_v33, %v1020_v10 }
 0x341   : > { %1142 = vst.msk [vmem:[%s305_s25] sm:$0xff] %vm452_vm2, %v1134_v35 }
 0x342 PF: > { %s18_s27 = sadd.s32 1, %s1327_s27  }
 0x343   : > { %p15_p4 = scmp.ge.s32.totalorder %s18_s27, 4  }
 0x345   :  { %17 = sbr.rel (!%p15_p4) target bundleno = 1 (0x1), region = 82 }

</bundles_post_ra>
